<compile_context>
chip_gen: v7x
topology: tpu7x:2x2x1
jax: 0.10.0
libtpu: 0.0.40
codegen_flags: <defaults>
</compile_context>

<pallas_src>
from functools import partial

import jax
import jax.numpy as jnp
from jax.experimental import pallas as pl
from jax.experimental.pallas import tpu as pltpu

# --------------------------- config constants --------------------------------
NUM_CLASSES = 3
FOCAL_ALPHA = (0.25, 0.5, 0.25)   # config.FOCAL_ALPHA  (per-class alpha)
FOCAL_GAMMA = 2.0                 # config.FOCAL_GAMMA
LABEL_SMOOTHING = 0.1             # config.LABEL_SMOOTHING

MAX_TILE_N = 16 * 1024            # batch rows (lanes) per grid step


# --------------------------------- kernel ------------------------------------
def _focal_loss_kernel(logits_ref, targets_ref, o_ref, *,
                       n_valid, n_classes, alpha, gamma, label_smoothing,
                       tile_n):
    """One lane-dense batch tile; writes this tile's partial loss sum."""
    x = logits_ref[...].astype(jnp.float32)      # (C, T)  classes on sublanes
    t = targets_ref[...]                         # (1, T)  int32

    # Per-class sublane rows -> pure elementwise (VPU) class reductions.
    rows = [x[c:c + 1, :] for c in range(n_classes)]          # C x (1, T)

    m = rows[0]
    for r in rows[1:]:
        m = jnp.maximum(m, r)
    se = jnp.exp(rows[0] - m)
    for r in rows[1:]:
        se = se + jnp.exp(r - m)
    lse = m + jnp.log(se)                                      # (1, T)

    sum_x = rows[0]
    for r in rows[1:]:
        sum_x = sum_x + r

    # Gather of x[target] / alpha[target] via a static select chain (no
    # data-dependent gather, alpha constant-folded).
    x_t = rows[n_classes - 1]
    a_t = jnp.full(t.shape, alpha[n_classes - 1], dtype=jnp.float32)
    for c in range(n_classes - 2, -1, -1):
        hit = t == c
        x_t = jnp.where(hit, rows[c], x_t)
        a_t = jnp.where(hit, alpha[c], a_t)

    # Label-smoothed cross entropy (log-space, no divides).
    nll = lse - x_t                                            # -log p_y
    smooth = lse - sum_x * (1.0 / n_classes)                   # mean_c(-log p_c)
    ce = (1.0 - label_smoothing) * nll + label_smoothing * smooth

    # Focal re-weighting.
    pt = jnp.exp(-ce)
    omp = 1.0 - pt
    if float(gamma) == 2.0:
        w = omp * omp
    elif float(gamma) == float(int(gamma)) and 0 <= int(gamma) <= 8:
        w = jnp.ones_like(omp)
        for _ in range(int(gamma)):
            w = w * omp
    else:
        # TODO(synk): non-integer gamma falls back to a transcendental pow.
        w = jnp.power(jnp.maximum(omp, jnp.float32(1e-30)), gamma)
    focal = a_t * w * ce                                       # (1, T)

    # Mask the ragged tail of the last tile (no host-side padding).
    col = (pl.program_id(0) * tile_n
           + jax.lax.broadcasted_iota(jnp.int32, focal.shape, 1))
    focal = jnp.where(col < n_valid, focal, 0.0)

    # This tile's partial sum -> its own fully aligned (8, 128) output block
    # (scalar in [0, 0], zeros elsewhere); host finishes the mean.
    s = jnp.sum(focal)
    r8 = jax.lax.broadcasted_iota(jnp.int32, (8, 128), 0)
    c8 = jax.lax.broadcasted_iota(jnp.int32, (8, 128), 1)
    o_ref[...] = jnp.where((r8 == 0) & (c8 == 0), s, 0.0)


# ----------------------------- host-side wrapper ------------------------------
def advanced_loss(logits, targets, focal_alpha=FOCAL_ALPHA,
                  gamma=FOCAL_GAMMA, label_smoothing=LABEL_SMOOTHING,
                  max_tile_n=MAX_TILE_N):
    """Mirrors AdvancedLoss.forward(inputs, targets) -> scalar loss."""
    n, c = logits.shape
    alpha = tuple(float(a) for a in focal_alpha)
    assert len(alpha) == c

    # Lane-dense layout: classes on sublanes, batch on lanes.
    logits_t = logits.T                              # (C, N), native dtype
    targets_2d = targets.reshape(1, n).astype(jnp.int32)

    # Batch tile: either the whole (small) batch, or a 128-multiple big tile.
    tile_n = n if n <= max_tile_n else max_tile_n
    grid_n = pl.cdiv(n, tile_n)

    partials = pl.pallas_call(
        partial(_focal_loss_kernel,
                n_valid=n, n_classes=c, alpha=alpha,
                gamma=float(gamma), label_smoothing=float(label_smoothing),
                tile_n=tile_n),
        grid=(grid_n,),
        in_specs=[
            pl.BlockSpec((c, tile_n), lambda i: (0, i)),   # logits (C, T) tile
            pl.BlockSpec((1, tile_n), lambda i: (0, i)),   # targets (1, T) tile
        ],
        out_specs=pl.BlockSpec((8, 128), lambda i: (i, 0)),  # per-tile partial
        out_shape=jax.ShapeDtypeStruct((grid_n * 8, 128), jnp.float32),
        compiler_params=pltpu.CompilerParams(
            dimension_semantics=("parallel",)),            # independent tiles
    )(logits_t, targets_2d)

    # Only [0, 0] of each per-tile slab is nonzero; finish the batch mean.
    return jnp.sum(partials) * (1.0 / n)


# ------------------------- pure-JAX reference (check) -------------------------
def _reference_loss(logits, targets, focal_alpha,
                    gamma=FOCAL_GAMMA, label_smoothing=LABEL_SMOOTHING):
    logp = jax.nn.log_softmax(logits.astype(jnp.float32), axis=-1)
    nll = -jnp.take_along_axis(logp, targets[:, None].astype(jnp.int32),
                               axis=1)[:, 0]
    smooth = -jnp.mean(logp, axis=-1)
    ce = (1.0 - label_smoothing) * nll + label_smoothing * smooth
    pt = jnp.exp(-ce)
    alpha_t = focal_alpha[targets]
    return jnp.mean(alpha_t * (1.0 - pt) ** gamma * ce)


# ----------------------------------- main --------------------------------------
if __name__ == "__main__":
    key = jax.random.PRNGKey(0)
    k_logits, k_targets = jax.random.split(key)

    batch = 8
    logits = jax.random.normal(k_logits, (batch, NUM_CLASSES), jnp.float32)
    targets = jax.random.randint(k_targets, (batch,), 0, NUM_CLASSES, jnp.int32)
    alpha = jnp.asarray(FOCAL_ALPHA, jnp.float32)

    loss_fn = jax.jit(advanced_loss)
    loss = jax.block_until_ready(loss_fn(logits, targets))

    ref = _reference_loss(logits, targets, alpha)
    assert loss.shape == ()
    assert bool(jnp.isfinite(loss))
    assert bool(jnp.allclose(loss, ref, rtol=1e-4, atol=1e-5)), (loss, ref)
    print("KERNEL_OK")
</pallas_src>

<mosaic_0001>
module attributes {stable_mosaic.version = 11 : i64} {
  func.func @_focal_loss_kernel(%arg0: i32, %arg1: memref<3x8xf32, #tpu.memory_space<vmem>>, %arg2: memref<1x8xi32, #tpu.memory_space<vmem>>, %arg3: memref<8x128xf32, #tpu.memory_space<vmem>>) attributes {dimension_semantics = [#tpu.dimension_semantics<parallel>], iteration_bounds = array<i64: 1>, scalar_prefetch = 0 : i64, scratch_operands = 0 : i64, tpu.core_type = #tpu.core_type<tc>, window_params = [{transform_indices = @transform_0, window_bounds = array<i64: 3, 8>}, {transform_indices = @transform_1, window_bounds = array<i64: 1, 8>}, {transform_indices = @transform_2, window_bounds = array<i64: 8, 128>}]} {
    %c0 = arith.constant 0 : index
    %c0_0 = arith.constant 0 : index
    %0 = vector.load %arg1[%c0, %c0_0] : memref<3x8xf32, #tpu.memory_space<vmem>>, vector<3x8xf32>
    %c0_1 = arith.constant 0 : index
    %c0_2 = arith.constant 0 : index
    %1 = vector.load %arg2[%c0_1, %c0_2] : memref<1x8xi32, #tpu.memory_space<vmem>>, vector<1x8xi32>
    %2 = vector.extract_strided_slice %0 {offsets = [0, 0], sizes = [1, 8], strides = [1, 1]} : vector<3x8xf32> to vector<1x8xf32>
    %3 = vector.extract_strided_slice %0 {offsets = [1, 0], sizes = [1, 8], strides = [1, 1]} : vector<3x8xf32> to vector<1x8xf32>
    %4 = vector.extract_strided_slice %0 {offsets = [2, 0], sizes = [1, 8], strides = [1, 1]} : vector<3x8xf32> to vector<1x8xf32>
    %5 = arith.maximumf %2, %3 : vector<1x8xf32>
    %6 = arith.maximumf %5, %4 : vector<1x8xf32>
    %7 = arith.subf %2, %6 : vector<1x8xf32>
    %8 = math.exp %7 : vector<1x8xf32>
    %9 = arith.subf %3, %6 : vector<1x8xf32>
    %10 = math.exp %9 : vector<1x8xf32>
    %11 = arith.addf %8, %10 : vector<1x8xf32>
    %12 = arith.subf %4, %6 : vector<1x8xf32>
    %13 = math.exp %12 : vector<1x8xf32>
    %14 = arith.addf %11, %13 : vector<1x8xf32>
    %15 = math.log %14 : vector<1x8xf32>
    %16 = arith.addf %6, %15 : vector<1x8xf32>
    %17 = arith.addf %2, %3 : vector<1x8xf32>
    %18 = arith.addf %17, %4 : vector<1x8xf32>
    %cst = arith.constant 2.500000e-01 : f32
    %19 = vector.broadcast %cst : f32 to vector<1x8xf32>
    %c1_i32 = arith.constant 1 : i32
    %20 = vector.broadcast %c1_i32 : i32 to vector<1x8xi32>
    %21 = arith.cmpi eq, %1, %20 : vector<1x8xi32>
    %22 = arith.select %21, %3, %4 : vector<1x8xi1>, vector<1x8xf32>
    %cst_3 = arith.constant 5.000000e-01 : f32
    %23 = vector.broadcast %cst_3 : f32 to vector<1x8xf32>
    %24 = arith.select %21, %23, %19 : vector<1x8xi1>, vector<1x8xf32>
    %c0_i32 = arith.constant 0 : i32
    %25 = vector.broadcast %c0_i32 : i32 to vector<1x8xi32>
    %26 = arith.cmpi eq, %1, %25 : vector<1x8xi32>
    %27 = arith.select %26, %2, %22 : vector<1x8xi1>, vector<1x8xf32>
    %cst_4 = arith.constant 2.500000e-01 : f32
    %28 = vector.broadcast %cst_4 : f32 to vector<1x8xf32>
    %29 = arith.select %26, %28, %24 : vector<1x8xi1>, vector<1x8xf32>
    %30 = arith.subf %16, %27 : vector<1x8xf32>
    %cst_5 = arith.constant 0.333333343 : f32
    %31 = vector.broadcast %cst_5 : f32 to vector<1x8xf32>
    %32 = arith.mulf %18, %31 : vector<1x8xf32>
    %33 = arith.subf %16, %32 : vector<1x8xf32>
    %cst_6 = arith.constant 0.899999976 : f32
    %34 = vector.broadcast %cst_6 : f32 to vector<1x8xf32>
    %35 = arith.mulf %34, %30 : vector<1x8xf32>
    %cst_7 = arith.constant 1.000000e-01 : f32
    %36 = vector.broadcast %cst_7 : f32 to vector<1x8xf32>
    %37 = arith.mulf %36, %33 : vector<1x8xf32>
    %38 = arith.addf %35, %37 : vector<1x8xf32>
    %cst_8 = arith.constant 0.000000e+00 : f32
    %39 = vector.broadcast %cst_8 : f32 to vector<1x8xf32>
    %40 = arith.subf %39, %38 : vector<1x8xf32>
    %41 = math.exp %40 : vector<1x8xf32>
    %cst_9 = arith.constant 1.000000e+00 : f32
    %42 = vector.broadcast %cst_9 : f32 to vector<1x8xf32>
    %43 = arith.subf %42, %41 : vector<1x8xf32>
    %44 = arith.mulf %43, %43 : vector<1x8xf32>
    %45 = arith.mulf %29, %44 : vector<1x8xf32>
    %46 = arith.mulf %45, %38 : vector<1x8xf32>
    %c8_i32 = arith.constant 8 : i32
    %47 = arith.muli %arg0, %c8_i32 : i32
    %48 = tpu.iota {dimensions = array<i32: 1>} : vector<1x8xi32>
    %49 = vector.broadcast %47 : i32 to vector<1x8xi32>
    %50 = arith.addi %49, %48 : vector<1x8xi32>
    %c8_i32_10 = arith.constant 8 : i32
    %51 = vector.broadcast %c8_i32_10 : i32 to vector<1x8xi32>
    %52 = arith.cmpi slt, %50, %51 : vector<1x8xi32>
    %cst_11 = arith.constant 0.000000e+00 : f32
    %53 = vector.broadcast %cst_11 : f32 to vector<1x8xf32>
    %54 = arith.select %52, %46, %53 : vector<1x8xi1>, vector<1x8xf32>
    %55 = vector.shape_cast %54 : vector<1x8xf32> to vector<1x1x8xf32>
    %cst_12 = arith.constant dense<0.000000e+00> : vector<1xf32>
    %56 = vector.multi_reduction <add>, %55, %cst_12 [1, 2] : vector<1x1x8xf32> to vector<1xf32>
    %57 = vector.shape_cast %56 : vector<1xf32> to vector<1x1x1xf32>
    %58 = vector.extract %57[0, 0, 0] : f32 from vector<1x1x1xf32>
    %59 = tpu.iota {dimensions = array<i32: 0>} : vector<8x128xi32>
    %60 = tpu.iota {dimensions = array<i32: 1>} : vector<8x128xi32>
    %c0_i32_13 = arith.constant 0 : i32
    %61 = vector.broadcast %c0_i32_13 : i32 to vector<8x128xi32>
    %62 = arith.cmpi eq, %59, %61 : vector<8x128xi32>
    %c0_i32_14 = arith.constant 0 : i32
    %63 = vector.broadcast %c0_i32_14 : i32 to vector<8x128xi32>
    %64 = arith.cmpi eq, %60, %63 : vector<8x128xi32>
    %65 = arith.andi %62, %64 : vector<8x128xi1>
    %cst_15 = arith.constant 0.000000e+00 : f32
    %66 = vector.broadcast %58 : f32 to vector<8x128xf32>
    %67 = vector.broadcast %cst_15 : f32 to vector<8x128xf32>
    %68 = arith.select %65, %66, %67 : vector<8x128xi1>, vector<8x128xf32>
    %c0_16 = arith.constant 0 : index
    %c0_17 = arith.constant 0 : index
    %69 = vector.load %arg3[%c0_16, %c0_17] : memref<8x128xf32, #tpu.memory_space<vmem>>, vector<8x128xf32>
    tpu.vector_store %arg3[%c0_16, %c0_17], %68 {strides = array<i32>} : memref<8x128xf32, #tpu.memory_space<vmem>>, vector<8x128xf32>,
    return
  }
  func.func @transform_0(%arg0: i32) -> (i32, i32) {
    %c0_i32 = arith.constant 0 : i32
    %c0_i32_0 = arith.constant 0 : i32
    return %c0_i32, %arg0 : i32, i32
  }
  func.func @transform_1(%arg0: i32) -> (i32, i32) {
    %c0_i32 = arith.constant 0 : i32
    %c0_i32_0 = arith.constant 0 : i32
    return %c0_i32, %arg0 : i32, i32
  }
  func.func @transform_2(%arg0: i32) -> (i32, i32) {
    %c0_i32 = arith.constant 0 : i32
    %c0_i32_0 = arith.constant 0 : i32
    return %arg0, %c0_i32 : i32, i32
  }
}

</mosaic_0001>

<bundles_post_ra>
// kernel: advanced_loss.1
= control target key start
LH: loop header
LB: loop body
LE: loop exit
PB: predicated region body
PF: predicated region fallthrough
CT: control target
= control target key end

     0   :  { %v135_v13 = vmov 1966171168   ;;  %v51_v15 = vlaneseq  ;;  %v136_v47 = vmov 0.25   ;;  %vm98_vm3 = vcmask 57344   ;;  %s165_s0 = inlined_call_operand.vmem [shape: f32[3,8], index: 0, kind: input, shape index: {}]   ;;  %s166_s1 = inlined_call_operand.vmem [shape: s32[1,8], index: 1, kind: input, shape index: {}]   ;;  %s167_s2 = inlined_call_operand.vmem [shape: f32[8,128], index: 2, kind: output, shape index: {}]  }
   0x1   :  { %v11_v0 = vld [vmem:[%s165_s0] sm:$0x7]  ;;  %v49_v14 = vunpack.c.l.s4 %v135_v13 }
   0x2   :  { %v14_v1 = vrot.slane %v11_v0, 1  ;;  %v17_v2 = vrot.slane %v11_v0, 2  ;;  %v52_v17 = vshrl.u32 %v51_v15, 7  ;;  %v12_v29 = vld [vmem:[%s166_s1] sm:$0x1]  ;;  %v93_v52 = vand.u32 127, %v51_v15 }
   0x3   :  { %v50_v16 = vunpack.c.0.s8 %v49_v14  ;;  %vm47_vm0 = vcmp.eq.s32.totalorder %v12_v29, 1  ;;  %vm75_vm1 = vcmp.eq.s32.totalorder %v12_v29, 0 }
   0x4   :  { %v16_v3 = vmax.f32 %v11_v0, %v14_v1  ;;  %v45_v30 = vadd.f32 %v14_v1, %v11_v0  ;;  %v74_v48 = vsel %vm47_vm0, 0.5, %v136_v47  ;;  %vm96_vm2 = vcmp.lt.s32.totalorder %v93_v52, 8 }
   0x5   :  { %v53_v20 = vsub.s32 %v50_v16, %v52_v17  ;;  %v77_v51 = vsel %vm75_vm1, 0.25, %v74_v48  ;;  %vm111_vm4 = vcmp.eq.s32.totalorder %v52_v17, 0  ;;  %vm112_vm5 = vcmp.eq.s32.totalorder %v93_v52, 0 }
   0x6   :  { %v19_v4 = vmax.f32 %v16_v3, %v17_v2  ;;  %v46_v33 = vadd.f32 %v45_v30, %v17_v2  ;;  %vm113_vm6 = vmand %vm111_vm4, %vm112_vm5 }
   0x7   :  { %v54_v25 = vrot.slane %v11_v0, %v53_v20 }
   0x8   :  { %v20_v5 = vsub.f32 %v11_v0, %v19_v4  ;;  %v24_v6 = vrot.slane %v19_v4, 7  ;;  %v33_v7 = vrot.slane %v19_v4, 6  ;;  %v79_v37 = vmul.f32 0.33333334, %v46_v33 }
   0x9   :  { %v55_v27 = vcombine.high %v54_v25, %v54_v25  ;;  %v62_v28 = vrot.slane %v54_v25, %v53_v20 }
   0xa   :  { %v21_v8 = vmul.f32 1.442695, %v20_v5  ;;  %v26_v9 = vsub.f32 %v11_v0, %v24_v6  ;;  %v35_v10 = vsub.f32 %v11_v0, %v33_v7 }
   0xb   :  { %v69_v31 = vrot.slane %v55_v27, %v53_v20  ;;  %v71_v32 = vcombine.high %v62_v28, %v62_v28 }
   0xc   :  { %v27_v11 = vmul.f32 1.442695, %v26_v9  ;;  %v36_v12 = vmul.f32 1.442695, %v35_v10  ;;  %125 = vpow2.f32 %v21_v8 }
   0xd   :  { %v73_v34 = vsel %vm47_vm0, %v69_v31, %v71_v32 }
   0xe   :  { %127 = vpow2.f32 %v27_v11  ;;  %v76_v38 = vsel %vm75_vm1, %v11_v0, %v73_v34 }
   0xf   :  { %129 = vpow2.f32 %v36_v12 }
  0x16   :  { %v126_v18 = vpop.eup %125 }
  0x18   :  { %v128_v19 = vpop.eup %127 }
  0x19   :  { %v130_v21 = vpop.eup %129  ;;  %v30_v22 = vrot.slane %v128_v19, 1 }
  0x1a   :  { %v39_v23 = vrot.slane %v130_v21, 2 }
  0x1b   :  { %v32_v24 = vadd.f32 %v126_v18, %v30_v22 }
  0x1d   :  { %v41_v26 = vadd.f32 %v39_v23, %v32_v24 }
  0x1f   :  { %131 = vlog2.f32 %v41_v26 }
  0x29   :  { %v132_v35 = vpop.eup %131 }
  0x2a   :  { %v43_v36 = vmul.f32 0.6931472, %v132_v35 }
  0x2c   :  { %v44_v39 = vadd.f32 %v43_v36, %v19_v4 }
  0x2e   :  { %v78_v40 = vsub.f32 %v44_v39, %v76_v38  ;;  %v80_v41 = vsub.f32 %v44_v39, %v79_v37 }
  0x30   :  { %v81_v42 = vmul.f32 0.9, %v78_v40  ;;  %v82_v43 = vmul.f32 0.1, %v80_v41 }
  0x32   :  { %v83_v44 = vadd.f32 %v82_v43, %v81_v42 }
  0x34   :  { %v84_v45 = vsub.f32 0.0, %v83_v44 }
  0x36   :  { %v85_v46 = vmul.f32 1.442695, %v84_v45 }
  0x38   :  { %133 = vpow2.f32 %v85_v46 }
  0x42   :  { %v134_v49 = vpop.eup %133 }
  0x43   :  { %v87_v50 = vsub.f32 1.0, %v134_v49 }
  0x45   :  { %v88_v53 = vmul.f32 %v87_v50, %v87_v50 }
  0x47   :  { %v89_v54 = vmul.f32 %v88_v53, %v77_v51 }
  0x49   :  { %v90_v55 = vmul.f32 %v89_v54, %v83_v44 }
  0x4b   :  { %v97_v56 = vsel %vm96_vm2, %v90_v55, 0.0 }
  0x4c   :  { %v99_v57 = vsel %vm98_vm3, %v97_v56, 0.0 }
  0x4d   :  { %100 = vadd.xlane.f32.xlu0 %v99_v57 }
  0xda   :  { %v101_v58 = vpop.xlane.xlu0 %100 }
  0xdb   :  { %v102_v59 = vrot.slane %v101_v58, 4 }
  0xdd   :  { %v103_v60 = vadd.f32 %v102_v59, %v101_v58 }
  0xdf   :  { %v104_v61 = vrot.slane %v103_v60, 2 }
  0xe1   :  { %v105_v62 = vadd.f32 %v104_v61, %v103_v60 }
  0xe3   :  { %v106_v63 = vrot.slane %v105_v62, 1 }
  0xe5   :  { %v107_v0 = vadd.f32 %v106_v63, %v105_v62 }
  0xe7   :  { %121 = vpush %v107_v0 }
 0x118   :  { %s122_s1 = spop %121 }
 0x119   :  { %v114_v1 = vstv %s122_s1 }
 0x11a   :  { %v115_v2 = vsel %vm113_vm6, %v114_v1, 0.0 }
 0x11b   :  { %116 = vst [vmem:[%s167_s2] sm:$0xff] %v115_v2 }

</bundles_post_ra>
